<compile_context>
chip_gen: v7x
topology: tpu7x:2x2x1
jax: 0.10.0
libtpu: 0.0.40
codegen_flags: <defaults>
</compile_context>

<pallas_src>
import math
import jax
import jax.numpy as jnp
from jax.experimental import pallas as pl
from jax.experimental.pallas import tpu as pltpu


def _timestep_embedder_kernel(t_ref, freqs_ref, w1_ref, b1_ref, w2_ref, b2_ref, o_ref):
    f32 = jnp.float32
    t = t_ref[...].astype(f32)            # (TB, 1)
    freqs = freqs_ref[...].astype(f32)    # (1, half)

    # Sinusoidal embedding: args = t * freqs ; emb = [cos(args) | sin(args)]  -> (TB, F)
    args = t * freqs
    emb = jnp.concatenate([jnp.cos(args), jnp.sin(args)], axis=-1)

    # fc1 + SiLU  (single full-width matmul, f32 accumulation on the MXU)
    h = jnp.dot(emb.astype(w1_ref.dtype), w1_ref[...], preferred_element_type=f32)
    h = h + b1_ref[...].astype(f32)
    h = h * jax.nn.sigmoid(h)             # SiLU in f32 (EUP handles the exp)

    # fc2
    out = jnp.dot(h.astype(w2_ref.dtype), w2_ref[...], preferred_element_type=f32)
    out = out + b2_ref[...].astype(f32)
    o_ref[...] = out.astype(o_ref.dtype)


def timestep_embedder_forward(t, params, *, frequency_embedding_size=256,
                              max_period=10000.0):
    """t: (B,) timesteps. params: W1 (H,F), b1 (H,), W2 (H,H), b2 (H,) as in nn.Linear."""
    B = t.shape[0]
    F = frequency_embedding_size
    H = params["W2"].shape[0]
    half = F // 2
    assert F % 2 == 0  # TODO(synk): odd frequency_embedding_size zero-pad column not implemented
    assert params["W1"].shape == (H, F)

    # Host-side constants / pre-transposed weights. For static params do this once
    # outside the jitted step to avoid per-call transposes.
    freqs = jnp.exp(-math.log(max_period)
                    * jnp.arange(half, dtype=jnp.float32) / half).reshape(1, half)
    w_dtype = params["W1"].dtype
    w1_t = params["W1"].T                         # (F, H)
    b1 = params["b1"].reshape(1, H)
    w2_t = params["W2"].T                         # (H, H)
    b2 = params["b2"].reshape(1, H)

    # Batch tiling: full batch in one tile when small; 128-row tiles otherwise.
    if B <= 128:
        TB, Bpad = B, B
    else:
        TB = 128
        Bpad = pl.cdiv(B, TB) * TB
    t2 = t.astype(jnp.float32).reshape(B, 1)
    if Bpad != B:
        t2 = jnp.pad(t2, ((0, Bpad - B), (0, 0)))

    grid = (Bpad // TB,)

    in_specs = [
        pl.BlockSpec((TB, 1), lambda i: (i, 0)),       # t (per-batch-tile)
        pl.BlockSpec((1, half), lambda i: (0, 0)),     # freqs (resident)
        pl.BlockSpec((F, H), lambda i: (0, 0)),        # W1^T (resident)
        pl.BlockSpec((1, H), lambda i: (0, 0)),        # b1
        pl.BlockSpec((H, H), lambda i: (0, 0)),        # W2^T (resident)
        pl.BlockSpec((1, H), lambda i: (0, 0)),        # b2
    ]
    out_spec = pl.BlockSpec((TB, H), lambda i: (i, 0))

    itemsize = jnp.dtype(w_dtype).itemsize
    cost = pl.CostEstimate(
        flops=2 * Bpad * (F * H + H * H),
        transcendentals=Bpad * (F + H),
        bytes_accessed=(t2.size + freqs.size) * 4
        + (w1_t.size + b1.size + w2_t.size + b2.size) * itemsize
        + Bpad * H * itemsize,
    )

    out = pl.pallas_call(
        _timestep_embedder_kernel,
        out_shape=jax.ShapeDtypeStruct((Bpad, H), w_dtype),
        grid=grid,
        in_specs=in_specs,
        out_specs=out_spec,
        compiler_params=pltpu.CompilerParams(dimension_semantics=("parallel",)),
        cost_estimate=cost,
    )(t2, freqs, w1_t, b1, w2_t, b2)

    return out[:B]


def reference(t, params, *, frequency_embedding_size=256, max_period=10000.0):
    """Pure-JAX reference mirroring the PyTorch forward."""
    F = frequency_embedding_size
    half = F // 2
    freqs = jnp.exp(-math.log(max_period)
                    * jnp.arange(half, dtype=jnp.float32) / half)
    args = t.astype(jnp.float32)[:, None] * freqs[None]
    emb = jnp.concatenate([jnp.cos(args), jnp.sin(args)], axis=-1)
    emb = emb.astype(params["W1"].dtype)
    h = emb @ params["W1"].T + params["b1"]
    h = h * jax.nn.sigmoid(h)
    return h @ params["W2"].T + params["b2"]


if __name__ == "__main__":
    B = 8            # batch of timesteps
    F = 256          # frequency_embedding_size (default)
    H = 128          # hidden_size (lane-aligned)

    key = jax.random.PRNGKey(0)
    ks = jax.random.split(key, 5)

    def w(k, shape, s=0.05):
        return jax.random.normal(k, shape, jnp.float32) * s

    params = dict(
        W1=w(ks[0], (H, F)), b1=w(ks[1], (H,)),
        W2=w(ks[2], (H, H)), b2=w(ks[3], (H,)),
    )
    t = jax.random.uniform(ks[4], (B,), jnp.float32, 0.0, 1000.0)

    out = timestep_embedder_forward(t, params, frequency_embedding_size=F)
    out = jax.block_until_ready(out)

    ref = jax.block_until_ready(reference(t, params, frequency_embedding_size=F))
    max_err = float(jnp.max(jnp.abs(out - ref)))
    assert max_err < 1e-2, f"mismatch vs reference: max abs err = {max_err}"

    print("KERNEL_OK")
</pallas_src>

<mosaic_0001>
module attributes {stable_mosaic.version = 11 : i64} {
  func.func @_timestep_embedder_kernel(%arg0: i32, %arg1: memref<8x1xf32, #tpu.memory_space<vmem>>, %arg2: memref<1x128xf32, #tpu.memory_space<vmem>>, %arg3: memref<256x128xf32, #tpu.memory_space<vmem>>, %arg4: memref<1x128xf32, #tpu.memory_space<vmem>>, %arg5: memref<128x128xf32, #tpu.memory_space<vmem>>, %arg6: memref<1x128xf32, #tpu.memory_space<vmem>>, %arg7: memref<8x128xf32, #tpu.memory_space<vmem>>) attributes {dimension_semantics = [#tpu.dimension_semantics<parallel>], iteration_bounds = array<i64: 1>, scalar_prefetch = 0 : i64, scratch_operands = 0 : i64, tpu.core_type = #tpu.core_type<tc>, window_params = [{transform_indices = @transform_0, window_bounds = array<i64: 8, 1>}, {pipeline_mode = #tpu.pipeline_mode<synchronous>, transform_indices = @transform_1, window_bounds = array<i64: 1, 128>}, {pipeline_mode = #tpu.pipeline_mode<synchronous>, transform_indices = @transform_2, window_bounds = array<i64: 256, 128>}, {pipeline_mode = #tpu.pipeline_mode<synchronous>, transform_indices = @transform_3, window_bounds = array<i64: 1, 128>}, {pipeline_mode = #tpu.pipeline_mode<synchronous>, transform_indices = @transform_4, window_bounds = array<i64: 128, 128>}, {pipeline_mode = #tpu.pipeline_mode<synchronous>, transform_indices = @transform_5, window_bounds = array<i64: 1, 128>}, {transform_indices = @transform_6, window_bounds = array<i64: 8, 128>}]} {
    %c0 = arith.constant 0 : index
    %c0_0 = arith.constant 0 : index
    %0 = vector.load %arg1[%c0, %c0_0] : memref<8x1xf32, #tpu.memory_space<vmem>>, vector<8x1xf32>
    %c0_1 = arith.constant 0 : index
    %c0_2 = arith.constant 0 : index
    %1 = vector.load %arg2[%c0_1, %c0_2] : memref<1x128xf32, #tpu.memory_space<vmem>>, vector<1x128xf32>
    %2 = vector.broadcast %0 : vector<8x1xf32> to vector<8x128xf32>
    %3 = vector.broadcast %1 : vector<1x128xf32> to vector<8x128xf32>
    %4 = arith.mulf %2, %3 : vector<8x128xf32>
    %5 = math.cos %4 : vector<8x128xf32>
    %6 = math.sin %4 : vector<8x128xf32>
    %7 = tpu.concatenate %5, %6 in 1 : vector<8x128xf32>, vector<8x128xf32> -> vector<8x256xf32>
    %c0_3 = arith.constant 0 : index
    %c0_4 = arith.constant 0 : index
    %8 = vector.load %arg3[%c0_3, %c0_4] : memref<256x128xf32, #tpu.memory_space<vmem>>, vector<256x128xf32>
    %cst = arith.constant dense<0.000000e+00> : vector<8x128xf32>
    %9 = tpu.matmul %7, %8, %cst {dimension_numbers = #tpu.dot_dimension_numbers<[1], [0], [0], [1], [0, 0, 1, 1], [], []>} : vector<8x256xf32>, vector<256x128xf32>, vector<8x128xf32> -> vector<8x128xf32>
    %c0_5 = arith.constant 0 : index
    %c0_6 = arith.constant 0 : index
    %10 = vector.load %arg4[%c0_5, %c0_6] : memref<1x128xf32, #tpu.memory_space<vmem>>, vector<1x128xf32>
    %11 = vector.broadcast %10 : vector<1x128xf32> to vector<8x128xf32>
    %12 = arith.addf %9, %11 : vector<8x128xf32>
    %13 = arith.negf %12 : vector<8x128xf32>
    %14 = math.exp %13 : vector<8x128xf32>
    %cst_7 = arith.constant 1.000000e+00 : f32
    %15 = vector.broadcast %cst_7 : f32 to vector<8x128xf32>
    %16 = arith.addf %15, %14 : vector<8x128xf32>
    %17 = arith.divf %15, %16 : vector<8x128xf32>
    %18 = arith.mulf %12, %17 : vector<8x128xf32>
    %c0_8 = arith.constant 0 : index
    %c0_9 = arith.constant 0 : index
    %19 = vector.load %arg5[%c0_8, %c0_9] : memref<128x128xf32, #tpu.memory_space<vmem>>, vector<128x128xf32>
    %cst_10 = arith.constant dense<0.000000e+00> : vector<8x128xf32>
    %20 = tpu.matmul %18, %19, %cst_10 {dimension_numbers = #tpu.dot_dimension_numbers<[1], [0], [0], [1], [0, 0, 1, 1], [], []>} : vector<8x128xf32>, vector<128x128xf32>, vector<8x128xf32> -> vector<8x128xf32>
    %c0_11 = arith.constant 0 : index
    %c0_12 = arith.constant 0 : index
    %21 = vector.load %arg6[%c0_11, %c0_12] : memref<1x128xf32, #tpu.memory_space<vmem>>, vector<1x128xf32>
    %22 = vector.broadcast %21 : vector<1x128xf32> to vector<8x128xf32>
    %23 = arith.addf %20, %22 : vector<8x128xf32>
    %c0_13 = arith.constant 0 : index
    %c0_14 = arith.constant 0 : index
    %24 = vector.load %arg7[%c0_13, %c0_14] : memref<8x128xf32, #tpu.memory_space<vmem>>, vector<8x128xf32>
    tpu.vector_store %arg7[%c0_13, %c0_14], %23 {strides = array<i32>} : memref<8x128xf32, #tpu.memory_space<vmem>>, vector<8x128xf32>,
    return
  }
  func.func @transform_0(%arg0: i32) -> (i32, i32) {
    %c0_i32 = arith.constant 0 : i32
    %c0_i32_0 = arith.constant 0 : i32
    return %arg0, %c0_i32 : i32, i32
  }
  func.func @transform_1(%arg0: i32) -> (i32, i32) {
    %c0_i32 = arith.constant 0 : i32
    %c0_i32_0 = arith.constant 0 : i32
    %c0_i32_1 = arith.constant 0 : i32
    return %c0_i32, %c0_i32_0 : i32, i32
  }
  func.func @transform_2(%arg0: i32) -> (i32, i32) {
    %c0_i32 = arith.constant 0 : i32
    %c0_i32_0 = arith.constant 0 : i32
    %c0_i32_1 = arith.constant 0 : i32
    return %c0_i32, %c0_i32_0 : i32, i32
  }
  func.func @transform_3(%arg0: i32) -> (i32, i32) {
    %c0_i32 = arith.constant 0 : i32
    %c0_i32_0 = arith.constant 0 : i32
    %c0_i32_1 = arith.constant 0 : i32
    return %c0_i32, %c0_i32_0 : i32, i32
  }
  func.func @transform_4(%arg0: i32) -> (i32, i32) {
    %c0_i32 = arith.constant 0 : i32
    %c0_i32_0 = arith.constant 0 : i32
    %c0_i32_1 = arith.constant 0 : i32
    return %c0_i32, %c0_i32_0 : i32, i32
  }
  func.func @transform_5(%arg0: i32) -> (i32, i32) {
    %c0_i32 = arith.constant 0 : i32
    %c0_i32_0 = arith.constant 0 : i32
    %c0_i32_1 = arith.constant 0 : i32
    return %c0_i32, %c0_i32_0 : i32, i32
  }
  func.func @transform_6(%arg0: i32) -> (i32, i32) {
    %c0_i32 = arith.constant 0 : i32
    %c0_i32_0 = arith.constant 0 : i32
    return %arg0, %c0_i32 : i32, i32
  }
}

</mosaic_0001>

<bundles_post_ra>
// kernel: tpu_custom_call.1
= control target key start
LH: loop header
LB: loop body
LE: loop exit
PB: predicated region body
PF: predicated region fallthrough
CT: control target
= control target key end

     0   :  { %11 = vsyncpa [#allocation3], 0  ;;  %s873_s0 = inlined_call_operand.vmem [shape: f32[8,1], index: 0, kind: input, shape index: {}]   ;;  %s874_s1 = inlined_call_operand.vmem [shape: f32[1,128], index: 1, kind: input, shape index: {}]   ;;  %s875_s2 = inlined_call_operand.hbm [shape: f32[256,128], index: 2, kind: input, shape index: {}]   ;;  %s876_s3 = inlined_call_operand.vmem [shape: f32[1,128], index: 3, kind: input, shape index: {}]   ;;  %s877_s4 = inlined_call_operand.hbm [shape: f32[128,128], index: 4, kind: input, shape index: {}]   ;;  %s878_s5 = inlined_call_operand.vmem [shape: f32[1,128], index: 5, kind: input, shape index: {}]   ;;  %s879_s6 = inlined_call_operand.hbm [shape: f32[8,128], index: 6, kind: output, shape index: {}]  }
   0x1   :  { %12 = vsyncpa [#allocation6], 0 }
   0x2   :  { %13 = vsyncpa [#allocation4], 0  ;;  %s754_s21 = smov [#allocation2]   ;;  %s682_s25 = scalar_lea.hbm %s875_s2, 4096 }
   0x3   :  { %s23_s22 = sshll.u32 %s754_s21, 4  ;;  %p683_p0 = scmp.ne.s32.totalorder %s875_s2, %s682_s25  ;;  %s24_s22 = int_to_ptr.vmem [resolvable:$true] %s23_s22 }
   0x4   :  { %p686_p1 = scmp.lt.u32.totalorder %s682_s25, %s875_s2 }
   0x6   :  { %p688_p2 = pnand %p686_p1, %p683_p0 }
   0x8   :  { %691 = shalt.err (!%p688_p2)
}
   0x9   :  { %s692_s30 = scalar_lea.vmem %s24_s22, 4096  ;;  %p697_p4 = scmp.lt.s32.totalorder %s24_s22, %s24_s22 }
   0xa   :  { %p693_p3 = scmp.ne.s32.totalorder %s24_s22, %s692_s30  ;;  %p698_p5 = scmp.lt.s32.totalorder %s692_s30, %s692_s30 }
   0xc   :  { %p699_p6 = por %p698_p5, %p697_p4 }
   0xe   :  { %p700_p7 = pnand %p699_p6, %p693_p3 }
  0x10   :  { %703 = shalt.err (!%p700_p7)
}
  0x11   :  { %s755_s7 = smov 128   ;;  %s756_s8 = smov 8  }
  0x12   :  { %29 = dma.hbm_to_vmem [thread:$0]  %s875_s2, 4096, %s24_s22, [#allocation3], %s755_s7, %s755_s7, %s756_s8  }
  0x13   :  { %s757_s11 = smov [#allocation5]   ;;  %s704_s15 = scalar_lea.hbm %s877_s4, 2048 }
  0x14   :  { %s37_s12 = sshll.u32 %s757_s11, 4  ;;  %p705_p8 = scmp.ne.s32.totalorder %s877_s4, %s704_s15  ;;  %s38_s12 = int_to_ptr.vmem [resolvable:$true] %s37_s12 }
  0x15   :  { %p708_p9 = scmp.lt.u32.totalorder %s704_s15, %s877_s4 }
  0x17   :  { %p710_p10 = pnand %p708_p9, %p705_p8 }
  0x19   :  { %713 = shalt.err (!%p710_p10)
}
  0x1a   :  { %s714_s20 = scalar_lea.vmem %s38_s12, 2048  ;;  %p719_p12 = scmp.lt.s32.totalorder %s38_s12, %s38_s12 }
  0x1b   :  { %p715_p11 = scmp.ne.s32.totalorder %s38_s12, %s714_s20  ;;  %p720_p13 = scmp.lt.s32.totalorder %s714_s20, %s714_s20 }
  0x1d   :  { %p721_p0 = por %p720_p13, %p719_p12 }
  0x1f   :  { %p722_p1 = pnand %p721_p0, %p715_p11 }
  0x21   :  { %725 = shalt.err (!%p722_p1)
}
  0x22   :  { %43 = dma.hbm_to_vmem [thread:$0]  %s877_s4, 2048, %s38_s12, [#allocation6], %s755_s7, %s755_s7, %s756_s8  }
  0x23   :  { %748 = dma.done.wait [#allocation3], 4096  }
  0x24   :  { %749 = vsyncadd [#allocation3], 4294963200 }
  0x25   :  { %750 = dma.done.wait [#allocation6], 2048  }
  0x26   :  { %751 = vsyncadd [#allocation6], 4294965248  ;;  %v758_v0 = vmov 0   ;;  %v52_v1 = vld [vmem:[%s873_s0] sm:$0xff]  ;;  %v290_v3 = vld [vmem:[#allocation2 + $0x88] sm:$0xff]  ;;  %s768_s27 = smov [#allocation7]  }
  0x27   :  { %673 = vset.pattern.permute.xlu0 %v758_v0  ;;  %v289_v2 = vld [vmem:[#allocation2 + $0x80] sm:$0xff]  ;;  %v274_v6 = vld [vmem:[#allocation2 + $0x8] sm:$0xff]  ;;  %v291_v7 = vld [vmem:[#allocation2 + $0x90] sm:$0xff]  ;;  %v759_v0 = vmov 2102212464   ;;  %s489_s28 = sshll.u32 %s768_s27, 4  ;;  %s490_s28 = int_to_ptr.vmem [resolvable:$true] %s489_s28 }
  0x28   :  { %56 = vperm.xlu0 %673, %v52_v1   ;;  %v273_v4 = vld [vmem:[#allocation2] sm:$0xff]  ;;  %v598_v5 = vpack.c.bf16 %v290_v3, %v289_v2  ;;  %v292_v8 = vld [vmem:[#allocation2 + $0x98] sm:$0xff]  ;;  %v275_v11 = vld [vmem:[#allocation2 + $0x10] sm:$0xff]  ;;  %v760_v2 = vmov 920167782   ;;  %p731_p3 = scmp.lt.s32.totalorder %s490_s28, %s490_s28 }
  0x29   :  { %v600_v9 = vpack.c.bf16 %v274_v6, %v273_v4  ;;  %v602_v10 = vpack.c.bf16 %v292_v8, %v291_v7  ;;  %v276_v12 = vld [vmem:[#allocation2 + $0x18] sm:$0xff]  ;;  %v293_v13 = vld [vmem:[#allocation2 + $0xa0] sm:$0xff]  ;;  %v294_v14 = vld [vmem:[#allocation2 + $0xa8] sm:$0xff]  ;;  %v761_v6 = vmov 1326507024  }
  0x2a   :  { %599 = vmatprep.subr.bf16.mxu0 %v598_v5  ;;  %v604_v15 = vpack.c.bf16 %v276_v12, %v275_v11  ;;  %v606_v16 = vpack.c.bf16 %v294_v14, %v293_v13  ;;  %v277_v17 = vld [vmem:[#allocation2 + $0x20] sm:$0xff]  ;;  %v278_v18 = vld [vmem:[#allocation2 + $0x28] sm:$0xff]  ;;  %v295_v19 = vld [vmem:[#allocation2 + $0xb0] sm:$0xff]  ;;  %v762_v8 = vmov 683565275  }
  0x2b   :  { %601 = vmatpush3.bf16.msra.mxu0 %v600_v9  ;;  %v296_v20 = vld [vmem:[#allocation2 + $0xb8] sm:$0xff]  ;;  %v608_v21 = vpack.c.bf16 %v278_v18, %v277_v17  ;;  %v279_v23 = vld [vmem:[#allocation2 + $0x30] sm:$0xff]  ;;  %v297_v25 = vld [vmem:[#allocation2 + $0xc0] sm:$0xff]  ;;  %v764_v13 = vmov 2131351028  }
  0x2c   :  { %603 = vmatprep.subr.bf16.mxu0 %v602_v10  ;;  %v610_v22 = vpack.c.bf16 %v296_v20, %v295_v19  ;;  %v280_v24 = vld [vmem:[#allocation2 + $0x38] sm:$0xff]  ;;  %v298_v26 = vld [vmem:[#allocation2 + $0xc8] sm:$0xff]  ;;  %v281_v29 = vld [vmem:[#allocation2 + $0x40] sm:$0xff]  ;;  %v763_v10 = vmov 2475754826  }
  0x2d   :  { %v612_v27 = vpack.c.bf16 %v280_v24, %v279_v23  ;;  %v614_v28 = vpack.c.bf16 %v298_v26, %v297_v25  ;;  %v282_v30 = vld [vmem:[#allocation2 + $0x48] sm:$0xff]  ;;  %v299_v31 = vld [vmem:[#allocation2 + $0xd0] sm:$0xff]  ;;  %v300_v32 = vld [vmem:[#allocation2 + $0xd8] sm:$0xff] }
  0x2e   :  { %v616_v33 = vpack.c.bf16 %v282_v30, %v281_v29  ;;  %v618_v34 = vpack.c.bf16 %v300_v32, %v299_v31  ;;  %v283_v35 = vld [vmem:[#allocation2 + $0x50] sm:$0xff]  ;;  %v284_v36 = vld [vmem:[#allocation2 + $0x58] sm:$0xff]  ;;  %v301_v37 = vld [vmem:[#allocation2 + $0xe0] sm:$0xff] }
  0x2f   :  { %605 = vmatpush3.bf16.msra.mxu0 %v604_v15  ;;  %v302_v38 = vld [vmem:[#allocation2 + $0xe8] sm:$0xff]  ;;  %v620_v39 = vpack.c.bf16 %v284_v36, %v283_v35  ;;  %v285_v41 = vld [vmem:[#allocation2 + $0x60] sm:$0xff]  ;;  %v303_v43 = vld [vmem:[#allocation2 + $0xf0] sm:$0xff] }
  0x30   :  { %607 = vmatprep.subr.bf16.mxu0 %v606_v16  ;;  %v622_v40 = vpack.c.bf16 %v302_v38, %v301_v37  ;;  %v286_v42 = vld [vmem:[#allocation2 + $0x68] sm:$0xff]  ;;  %v304_v44 = vld [vmem:[#allocation2 + $0xf8] sm:$0xff]  ;;  %v287_v47 = vld [vmem:[#allocation2 + $0x70] sm:$0xff] }
  0x31   :  { %v624_v45 = vpack.c.bf16 %v286_v42, %v285_v41  ;;  %v626_v46 = vpack.c.bf16 %v304_v44, %v303_v43  ;;  %v288_v48 = vld [vmem:[#allocation2 + $0x78] sm:$0xff]  ;;  %v499_v50 = vld [vmem:[%s874_s1] ss:$0 sm:$0xff] }
  0x32   :  { %v628_v49 = vpack.c.bf16 %v288_v48, %v287_v47 }
  0x33   :  { %609 = vmatpush3.bf16.msra.mxu0 %v608_v21 }
  0x34   :  { %611 = vmatprep.subr.bf16.mxu0 %v610_v22 }
  0x37   :  { %613 = vmatpush3.bf16.msra.mxu0 %v612_v27 }
  0x38   :  { %615 = vmatprep.subr.bf16.mxu0 %v614_v28 }
  0x3b   :  { %617 = vmatpush3.bf16.msra.mxu0 %v616_v33 }
  0x3c   :  { %619 = vmatprep.subr.bf16.mxu0 %v618_v34 }
  0x3f   :  { %621 = vmatpush3.bf16.msra.mxu0 %v620_v39 }
  0x40   :  { %623 = vmatprep.subr.bf16.mxu0 %v622_v40 }
  0x43   :  { %625 = vmatpush3.bf16.msra.mxu0 %v624_v45 }
  0x44   :  { %627 = vmatprep.subr.bf16.mxu0 %v626_v46 }
  0x47   :  { %629 = vmatpush3.bf16.msra.mxu0 %v628_v49 }
  0xa7   :  { %v57_v51 = vpop.permute.xlu0 %56 }
  0xa8   :  { %v834_v52 = vmul.f32 %v499_v50, %v57_v51 }
  0xaa   :  { %v69_v53 = vand.u32 2139095040, %v834_v52  ;;  %v66_v54 = vand.u32 2147483647, %v834_v52  ;;  %vm68_vm7 = vcmp.lt.s32.totalorder %v834_v52, 0  ;;  %vm158_vm15 = vweird.f32 %v834_v52 }
  0xac   :  { %v70_v55 = vshrl.u32 %v69_v53, 23  ;;  %v73_v57 = vand.u32 8388607, %v66_v54  ;;  %vm67_vm8 = vcmp.le.f32.partialorder %v66_v54, 0.7853982 }
  0xae   :  { %v500_v56 = vadd.s32 4294967169, %v70_v55  ;;  %v74_v60 = vor.u32 8388608, %v73_v57 }
  0xb0   :  { %v76_v58 = vadd.s32 1, %v500_v56  ;;  %v114_v4 = vshll.u32 %v74_v60, 8 }
  0xb2   :  { %vm77_vm0 = vcmp.gt.s32.totalorder %v76_v58, 0 }
  0xb3   :  { %v78_v59 = vsel %vm77_vm0, %v76_v58, 0  ;;  %vm766_vm0 = vmmov 0  }
  0xb4   :  { %v80_v61 = vand.u32 31, %v78_v59  ;;  %v79_v62 = vshrl.u32 %v78_v59, 5 }
  0xb6   :  { %v81_v63 = vsub.s32 32, %v80_v61  ;;  %v92_v1 = vshll.u32 %v759_v0, %v80_v61  ;;  %v95_v3 = vshll.u32 %v760_v2, %v80_v61  ;;  %v83_v9 = vshll.u32 %v762_v8, %v80_v61 }
  0xb7   :  { %v86_v12 = vshll.u32 %v763_v10, %v80_v61  ;;  %v89_v15 = vshll.u32 %v764_v13, %v80_v61  ;;  %vm101_vm1 = vcmp.lt.s32.totalorder %v79_v62, 4  ;;  %vm98_vm2 = vcmp.lt.s32.totalorder %v79_v62, 1 }
  0xb8   :  { %v93_v5 = vshrl.u32 %v760_v2, %v81_v63  ;;  %v96_v7 = vshrl.u32 %v761_v6, %v81_v63  ;;  %v84_v11 = vshrl.u32 %v763_v10, %v81_v63  ;;  %v87_v14 = vshrl.u32 %v764_v13, %v81_v63 }
  0xb9   :  { %v90_v16 = vshrl.u32 %v759_v0, %v81_v63  ;;  %v82_v20 = vshrl.u32 %v762_v8, %v81_v63  ;;  %vm99_vm3 = vcmp.lt.s32.totalorder %v79_v62, 2  ;;  %vm100_vm4 = vcmp.lt.s32.totalorder %v79_v62, 3 }
  0xba   :  { %v94_v17 = vor.u32 %v93_v5, %v92_v1  ;;  %v97_v18 = vor.u32 %v96_v7, %v95_v3  ;;  %v85_v19 = vor.u32 %v84_v11, %v83_v9  ;;  %v88_v21 = vor.u32 %v87_v14, %v86_v12 }
  0xbb   :  { %v91_v22 = vor.u32 %v90_v16, %v89_v15 }
  0xbc   :  { %v107_v23 = vsel %vm101_vm1, %v94_v17, 920167782  ;;  %v111_v24 = vsel %vm101_vm1, %v97_v18, 1326507024  ;;  %v106_v26 = vsel %vm98_vm2, %v85_v19, %v88_v21  ;;  %v102_v29 = vsel %vm98_vm2, %v82_v20, %v85_v19 }
  0xbd   :  { %v103_v25 = vsel %vm101_vm1, %v91_v22, 2102212464  ;;  %v108_v27 = vsel %vm100_vm4, %v91_v22, %v107_v23  ;;  %v110_v28 = vsel %vm98_vm2, %v88_v21, %v91_v22  ;;  %v112_v32 = vsel %vm100_vm4, %v94_v17, %v111_v24  ;;  %v389_v22 = vld [vmem:[#allocation5] sm:$0xff]  ;;  %v390_v23 = vld [vmem:[#allocation5 + $0x8] sm:$0xff] }
  0xbe   :  { %v104_v30 = vsel %vm100_vm4, %v88_v21, %v103_v25  ;;  %v109_v31 = vsel %vm99_vm3, %v106_v26, %v108_v27  ;;  %v113_v33 = vsel %vm99_vm3, %v110_v28, %v112_v32  ;;  %v631_v24 = vpack.c.bf16 %v390_v23, %v389_v22  ;;  %v391_v26 = vld [vmem:[#allocation5 + $0x10] sm:$0xff]  ;;  %v392_v27 = vld [vmem:[#allocation5 + $0x18] sm:$0xff] }
  0xbf   :  { %v840_v34 = vmul.u32.u64.low %v114_v4, %v109_v31  ;;  %v841_v35 = vmul.u32.u64.high %v114_v4, %v109_v31, %v840_v34  ;;  %v843_v36 = vmul.u32.u64.low %v114_v4, %v113_v33  ;;  %v844_v37 = vmul.u32.u64.high %v114_v4, %v113_v33, %v843_v36  ;;  %v395_v31 = vld [vmem:[#allocation5 + $0x30] sm:$0xff]  ;;  %v396_v32 = vld [vmem:[#allocation5 + $0x38] sm:$0xff] }
  0xc0   :  { %v105_v38 = vsel %vm99_vm3, %v102_v29, %v104_v30  ;;  %v765_v25 = vmov 0.0|0.0   ;;  %v634_v28 = vpack.c.bf16 %v392_v27, %v391_v26  ;;  %v393_v29 = vld [vmem:[#allocation5 + $0x20] sm:$0xff]  ;;  %v640_v33 = vpack.c.bf16 %v396_v32, %v395_v31 }
  0xc1   :  { %v124_v39 = vadd.s32 1, %v841_v35  ;;  %v121_v40 = vmul.u32 %v114_v4, %v105_v38  ;;  %vm123_vm5 = vc.u32 %v844_v37, %v840_v34  ;;  %v122_v53 = vadd.s32 %v840_v34, %v844_v37  ;;  %630 = vmatprep.subr.bf16.mxu1 %v765_v25  ;;  %v397_v34 = vld [vmem:[#allocation5 + $0x40] sm:$0xff]  ;;  %v399_v37 = vld [vmem:[#allocation5 + $0x50] sm:$0xff]  ;;  %v400_v38 = vld [vmem:[#allocation5 + $0x58] sm:$0xff] }
  0xc2   :  { %632 = vmatpush3.bf16.msra.mxu1 %v631_v24 }
  0xc3   :  { %v125_v41 = vsel %vm123_vm5, %v124_v39, %v841_v35  ;;  %633 = vmatprep.subr.bf16.mxu1 %v765_v25  ;;  %v398_v35 = vld [vmem:[#allocation5 + $0x48] sm:$0xff]  ;;  %v646_v39 = vpack.c.bf16 %v400_v38, %v399_v37 }
  0xc4   :  { %v126_v42 = vadd.s32 %v125_v41, %v121_v40  ;;  %v643_v36 = vpack.c.bf16 %v398_v35, %v397_v34  ;;  %v401_v40 = vld [vmem:[#allocation5 + $0x60] sm:$0xff]  ;;  %v402_v41 = vld [vmem:[#allocation5 + $0x68] sm:$0xff] }
  0xc6   :  { %v127_v43 = vadd.s32 536870912, %v126_v42  ;;  %635 = vmatpush3.bf16.msra.mxu1 %v634_v28 }
  0xc7   :  { %636 = vmatprep.subr.bf16.mxu1 %v765_v25 }
  0xc8   :  { %v128_v44 = vshrl.u32 %v127_v43, 30  ;;  %v649_v43 = vpack.c.bf16 %v402_v41, %v401_v40 }
  0xca   :  { %v129_v45 = vshll.u32 %v128_v44, 30  ;;  %v152_v2 = vsub.s32 4, %v128_v44 }
  0xcc   :  { %v130_v46 = vsub.s32 %v126_v42, %v129_v45  ;;  %v153_v5 = vsel %vm68_vm7, %v152_v2, %v128_v44  ;;  %v767_v42 = vmov 0.0   ;;  %v403_v44 = vld [vmem:[#allocation5 + $0x70] sm:$0xff]  ;;  %v404_v45 = vld [vmem:[#allocation5 + $0x78] sm:$0xff] }
  0xcd   :  { %v155_v7 = vsel %vm67_vm8, 0, %v153_v5  ;;  %595 = vmatprep.mubr.msk.f32.mxu1 %vm766_vm0, %v767_v42 }
  0xce   :  { %v132_v47 = vsub.s32 0, %v130_v46  ;;  %v262_v8 = vadd.s32 3, %v155_v7  ;;  %v159_v10 = vand.u32 3, %v155_v7 }
  0xd0   :  { %v501_v48 = vmin.u32 %v132_v47, %v130_v46  ;;  %v263_v9 = vand.u32 3, %v262_v8  ;;  %vm164_vm10 = vcmp.eq.s32.totalorder %v159_v10, 2  ;;  %vm161_vm12 = vcmp.eq.s32.totalorder %v159_v10, 0 }
  0xd1   :  { %vm160_vm14 = vcmp.lt.s32.totalorder %v159_v10, 2 }
  0xd2   :  { %v134_v49 = vclz %v501_v48  ;;  %vm268_vm9 = vcmp.eq.s32.totalorder %v263_v9, 2  ;;  %vm265_vm11 = vcmp.eq.s32.totalorder %v263_v9, 0  ;;  %vm264_vm13 = vcmp.lt.s32.totalorder %v263_v9, 2  ;;  %v508_v48 = vld [vmem:[%s876_s3] ss:$0 sm:$0xff]  ;;  %s726_s3 = scalar_lea.vmem %s490_s28, 128 }
  0xd3   :  { %p727_p2 = scmp.ne.s32.totalorder %s490_s28, %s726_s3  ;;  %p732_p4 = scmp.lt.s32.totalorder %s726_s3, %s726_s3 }
  0xd4   :  { %v502_v50 = vadd.s32 4294967294, %v134_v49 }
  0xd5   :  { %p733_p5 = por %p732_p4, %p731_p3 }
  0xd6   :  { %vm503_vm6 = vcmp.lt.s32.totalorder %v502_v50, 0 }
  0xd7   :  { %v137_v51 = vsel %vm503_vm6, 0, %v502_v50  ;;  %p734_p6 = pnand %p733_p5, %p727_p2 }
  0xd8   :  { %v138_v55 = vsub.s32 32, %v137_v51  ;;  %v142_v56 = vsub.s32 4294967266, %v137_v51  ;;  %v139_v57 = vshll.u32 %v130_v46, %v137_v51  ;;  %v652_v46 = vpack.c.bf16 %v404_v45, %v403_v44 }
  0xda   :  { %v140_v58 = vshrl.u32 %v122_v53, %v138_v55  ;;  %v143_v59 = vadd.s32 127, %v142_v56 }
  0xdc   :  { %v141_v60 = vor.u32 %v140_v58, %v139_v57  ;;  %v144_v61 = vshll.u32 %v143_v59, 23  ;;  %v510_v59 = vld [vmem:[%s878_s5] ss:$0 sm:$0xff] }
  0xde   :  { %v145_v62 = vor.u32 4788187, %v144_v61  ;;  %v148_v0 = vcvt.s32.f32 %v141_v60 }
  0xe0   :  { %v146_v63 = vand.u32 2147483647, %v145_v62 }
  0xe2   :  { %v149_v1 = vmul.f32 %v148_v0, %v146_v63 }
  0xe4   :  { %v150_v3 = vxor.u32 2147483648, %v149_v1 }
  0xe6   :  { %v151_v4 = vsel %vm68_vm7, %v150_v3, %v149_v1 }
  0xe7   :  { %v154_v6 = vsel %vm67_vm8, %v834_v52, %v151_v4  ;;  %v394_v52 = vld [vmem:[#allocation5 + $0x28] sm:$0xff] }
  0xe8   :  { %674 = vcosq.f32 %v154_v6  ;;  %v637_v30 = vpack.c.bf16 %v394_v52, %v393_v29 }
  0xe9   :  { %676 = vsinq.f32 %v154_v6 }
  0xea   :  { %638 = vmatpush3.bf16.msra.mxu1 %v637_v30 }
  0xeb   :  { %639 = vmatprep.subr.bf16.mxu1 %v765_v25 }
  0xee   :  { %641 = vmatpush3.bf16.msra.mxu1 %v640_v33 }
  0xef   :  { %642 = vmatprep.subr.bf16.mxu1 %v765_v25 }
  0xf2   :  { %v675_v11 = vpop.eup %674  ;;  %644 = vmatpush3.bf16.msra.mxu1 %v643_v36 }
  0xf3   :  { %v677_v12 = vpop.eup %676  ;;  %v165_v13 = vxor.u32 2147483648, %v675_v11  ;;  %645 = vmatprep.subr.bf16.mxu1 %v765_v25 }
  0xf4   :  { %v162_v14 = vxor.u32 2147483648, %v677_v12 }
  0xf5   :  { %v270_v15 = vsel %vm268_vm9, %v165_v13, %v677_v12  ;;  %v166_v54 = vsel %vm164_vm10, %v165_v13, %v677_v12 }
  0xf6   :  { %v267_v16 = vsel %vm265_vm11, %v675_v11, %v162_v14  ;;  %v163_v17 = vsel %vm161_vm12, %v675_v11, %v162_v14  ;;  %647 = vmatpush3.bf16.msra.mxu1 %v646_v39 }
  0xf7   :  { %v271_v18 = vsel %vm264_vm13, %v267_v16, %v270_v15  ;;  %v167_v19 = vsel %vm160_vm14, %v163_v17, %v166_v54  ;;  %648 = vmatprep.subr.bf16.mxu1 %v765_v25 }
  0xf8   :  { %v272_v20 = vsel %vm158_vm15, nan, %v271_v18  ;;  %v168_v21 = vsel %vm158_vm15, nan, %v167_v19 }
  0xf9   :  { %376 = vmatprep.mubr.f32.mxu0 %v272_v20 }
  0xfa   :  { %377 = vmatmul.mubr.f32.vlgmr.msra.gmra.mrb[0].mxu0 %v168_v21  ;;  %650 = vmatpush3.bf16.msra.mxu1 %v649_v43 }
  0xfb   :  { %651 = vmatprep.subr.bf16.mxu1 %v765_v25 }
  0xfe   :  { %653 = vmatpush3.bf16.msra.mxu1 %v652_v46 }
 0x1cd   :  { %v543_v47 = vpop.f32.mrb[0].mxu0 }
 0x1ce   :  { %v544_v49 = vpop.f32.mrb[1].mxu0 }
 0x1cf   :  { %v545_v50 = vadd.f32 %v544_v49, %v543_v47 }
 0x1d1   :  { %v379_v51 = vadd.f32 %v545_v50, %v508_v48 }
 0x1d3   :  { %v509_v53 = vmul.f32 -1.442695, %v379_v51 }
 0x1d5   :  { %678 = vpow2.f32 %v509_v53 }
 0x1df   :  { %v679_v55 = vpop.eup %678 }
 0x1e0   :  { %v385_v56 = vadd.f32 1.0, %v679_v55 }
 0x1e2   :  { %680 = vrcp.f32 %v385_v56 }
 0x1ec   :  { %v681_v57 = vpop.eup %680 }
 0x1ed   :  { %v388_v58 = vmul.f32 %v681_v57, %v379_v51 }
 0x1ef   :  { %596 = vmatmul.mubr.f32.vlgmr.msra.gmra.mrb[0].mxu1 %v388_v58 }
 0x2c2   :  { %v478_v60 = vpop.f32.mrb[0].mxu1 }
 0x2c3   :  { %v479_v61 = vadd.f32 %v510_v59, %v478_v60  ;;  %v597_v62 = vpop.f32.mrb[1].mxu1 }
 0x2c5   :  { %482 = vst [vmem:[#allocation7] sm:$0xff] %v479_v61 }
 0x2c6   :  { %737 = shalt.err (!%p734_p6)
}
 0x2c7   :  { %s738_s7 = scalar_lea.hbm %s879_s6, 128 }
 0x2c8   :  { %p739_p7 = scmp.ne.s32.totalorder %s879_s6, %s738_s7  ;;  %p742_p8 = scmp.lt.u32.totalorder %s738_s7, %s879_s6 }
 0x2ca   :  { %p744_p9 = pnand %p742_p8, %p739_p7 }
 0x2cc   :  { %747 = shalt.err (!%p744_p9)
}
 0x2cd   :  { %492 = dma.vmem_to_hbm [thread:$0]  %s490_s28, 128, %s879_s6, [#allocation4]  }
 0x2ce   :  { %752 = dma.done.wait [#allocation4], 128  }
 0x2cf   :  { %753 = vsyncadd [#allocation4], 4294967168 }
 0x2d0   :  { %496 = vsyncpa [#allocation3], 1 }
 0x2d1   :  { %497 = vsyncpa [#allocation6], 1 }
 0x2d2   :  { %498 = vsyncpa [#allocation4], 1 }

</bundles_post_ra>
